<compile_context>
chip_gen: v6e
topology: v6e:2x2x1
jax: 0.10.0
libtpu: 0.0.40
codegen_flags: <defaults>
</compile_context>

<pallas_src>
import jax
import jax.numpy as jnp
from jax.experimental import pallas as pl
from jax.experimental.pallas import tpu as pltpu

LANE = 128
_SMALL_FAST_PATH_BYTES = 64 * 1024       # below this, let XLA fuse the op
_V5_BLOCK_BYTES = 2 * 1024 * 1024        # v5e: 16 MiB scoped-VMEM default
_DEFAULT_BLOCK_BYTES = 4 * 1024 * 1024   # v6e/v7x: 4 bufs x 4 MiB = 16 MiB
_MAX_MIN_TILE_BYTES = 4 * 1024 * 1024    # bail to jnp if an 8-row tile exceeds this


def _hsigmoid_kernel(x_ref, o_ref):
    x = x_ref[...]
    # relu6(x + 3) / 6  == clamp(x + 3, 0, 6) / 6
    y = jnp.minimum(jnp.maximum(x + 3.0, 0.0), 6.0) / 6.0
    o_ref[...] = y.astype(o_ref.dtype)


def _hsigmoid_jnp(x):
    return (jnp.minimum(jnp.maximum(x + 3.0, 0.0), 6.0) / 6.0).astype(x.dtype)


def _round_up(a: int, m: int) -> int:
    return ((a + m - 1) // m) * m


def _block_config():
    """(block_bytes, vmem_limit_bytes) chosen per TPU generation."""
    try:
        kind = jax.devices()[0].device_kind.lower()
    except Exception:
        kind = ""
    if any(tag in kind for tag in ("v2", "v3", "v4", "v5")):
        # Older/smaller scoped-VMEM defaults (v5e: 16 MiB): keep 2 MiB blocks.
        return _V5_BLOCK_BYTES, None
    # v6e / v7x: 4 MiB blocks, explicit 32 MiB scoped limit (ample headroom).
    return _DEFAULT_BLOCK_BYTES, 32 * 1024 * 1024


def hsigmoid(x: jax.Array) -> jax.Array:
    """Elementwise hard-sigmoid matching F.relu6(x + 3.0) / 6.0."""
    orig_shape = x.shape
    dtype = x.dtype
    total = int(x.size)
    if total == 0:
        return x
    itemsize = jnp.dtype(dtype).itemsize

    # (1) Small-input fast path: pallas_call fixed cost dominates below ~64 KiB.
    if total * itemsize <= _SMALL_FAST_PATH_BYTES:
        return _hsigmoid_jnp(x)

    block_bytes, vmem_limit = _block_config()

    # (2) Pick a 2-D view with zero data movement:
    #     - lane-dense (rows, 128) when the flat size is lane-aligned (the
    #       common NCHW-activation case)
    #     - otherwise keep the trailing dim full (legal per the (8,128) rule)
    #       and grid over rows, avoiding the old pad + slice HBM round trips.
    if total % LANE == 0:
        rows, cols = total // LANE, LANE
    else:
        cols = orig_shape[-1] if len(orig_shape) >= 1 else 1
        rows = total // cols
    padded_cols = _round_up(cols, LANE)
    row_bytes = padded_cols * itemsize
    if rows < 1 or 8 * row_bytes > _MAX_MIN_TILE_BYTES:
        # Pathological trailing dim (e.g. a huge unaligned 1-D array): plain
        # XLA elementwise is already ~roofline, so just do it there.
        return _hsigmoid_jnp(x)

    x2d = x.reshape(rows, cols)

    # (3) Row tile: ~block_bytes per block, multiple of 8 sublanes.
    tr = max(8, ((block_bytes // row_bytes) // 8) * 8)
    tr = min(tr, _round_up(rows, 8))
    steps = pl.cdiv(rows, tr)

    # (4) Keep >= 2 grid steps and an even step count where possible so the
    #     v7x megacore splits the parallel axis evenly across both cores.
    if rows > 8:
        desired = steps
        if steps < 2:
            desired = 2
        elif steps % 2 == 1:
            desired = steps + 1
        if desired != steps:
            tr = max(8, _round_up(pl.cdiv(rows, desired), 8))
            steps = pl.cdiv(rows, tr)

    out2d = pl.pallas_call(
        _hsigmoid_kernel,
        out_shape=jax.ShapeDtypeStruct((rows, cols), dtype),
        grid_spec=pl.GridSpec(
            grid=(steps,),
            in_specs=[pl.BlockSpec((tr, cols), lambda i: (i, 0))],
            out_specs=pl.BlockSpec((tr, cols), lambda i: (i, 0)),
        ),
        compiler_params=pltpu.CompilerParams(
            dimension_semantics=("parallel",),
            vmem_limit_bytes=vmem_limit,
        ),
        cost_estimate=pl.CostEstimate(
            flops=3 * total,
            transcendentals=0,
            bytes_accessed=2 * total * itemsize,
        ),
    )(x2d)

    return out2d.reshape(orig_shape)


if __name__ == "__main__":
    key = jax.random.PRNGKey(0)
    k1, k2, k3 = jax.random.split(key, 3)

    def ref_fn(x):
        return jnp.clip(x + 3.0, 0.0, 6.0) / 6.0

    # 1) Small NCHW activation (batch=2, channels=4, spatial=16): fast path.
    x_small = jax.random.normal(k1, (2, 4, 16, 16), dtype=jnp.float32) * 4.0
    y_small = jax.block_until_ready(hsigmoid(x_small))
    assert y_small.shape == x_small.shape and y_small.dtype == x_small.dtype
    assert jnp.max(jnp.abs(y_small - ref_fn(x_small))) < 1e-6

    # 2) Lane-aligned input large enough to exercise the Pallas kernel (1 MiB).
    x_big = jax.random.normal(k2, (8, 32, 32, 32), dtype=jnp.float32) * 4.0
    y_big = jax.block_until_ready(hsigmoid(x_big))
    assert y_big.shape == x_big.shape and y_big.dtype == x_big.dtype
    assert jnp.max(jnp.abs(y_big - ref_fn(x_big))) < 1e-6

    # 3) Non-lane-aligned shape exercising the full-trailing-dim kernel path.
    x_odd = jax.random.normal(k3, (17, 33, 35), dtype=jnp.float32) * 4.0
    y_odd = jax.block_until_ready(hsigmoid(x_odd))
    assert y_odd.shape == x_odd.shape and y_odd.dtype == x_odd.dtype
    assert jnp.max(jnp.abs(y_odd - ref_fn(x_odd))) < 1e-6

    print("KERNEL_OK")
</pallas_src>

<mosaic_0001>
module attributes {stable_mosaic.version = 11 : i64} {
  func.func @_hsigmoid_kernel(%arg0: i32, %arg1: memref<1024x128xf32, #tpu.memory_space<vmem>>, %arg2: memref<1024x128xf32, #tpu.memory_space<vmem>>) attributes {dimension_semantics = [#tpu.dimension_semantics<parallel>], iteration_bounds = array<i64: 2>, scalar_prefetch = 0 : i64, scratch_operands = 0 : i64, tpu.core_type = #tpu.core_type<tc>, window_params = [{transform_indices = @transform_0, window_bounds = array<i64: 1024, 128>}, {transform_indices = @transform_1, window_bounds = array<i64: 1024, 128>}]} {
    %c0 = arith.constant 0 : index
    %c0_0 = arith.constant 0 : index
    %0 = vector.load %arg1[%c0, %c0_0] : memref<1024x128xf32, #tpu.memory_space<vmem>>, vector<1024x128xf32>
    %cst = arith.constant 3.000000e+00 : f32
    %1 = vector.broadcast %cst : f32 to vector<1024x128xf32>
    %2 = arith.addf %0, %1 : vector<1024x128xf32>
    %cst_1 = arith.constant 0.000000e+00 : f32
    %3 = vector.broadcast %cst_1 : f32 to vector<1024x128xf32>
    %4 = arith.maximumf %2, %3 : vector<1024x128xf32>
    %cst_2 = arith.constant 6.000000e+00 : f32
    %5 = vector.broadcast %cst_2 : f32 to vector<1024x128xf32>
    %6 = arith.minimumf %4, %5 : vector<1024x128xf32>
    %cst_3 = arith.constant 6.000000e+00 : f32
    %7 = vector.broadcast %cst_3 : f32 to vector<1024x128xf32>
    %8 = arith.divf %6, %7 : vector<1024x128xf32>
    %c0_4 = arith.constant 0 : index
    %c0_5 = arith.constant 0 : index
    %9 = vector.load %arg2[%c0_4, %c0_5] : memref<1024x128xf32, #tpu.memory_space<vmem>>, vector<1024x128xf32>
    tpu.vector_store %arg2[%c0_4, %c0_5], %8 {strides = array<i32>} : memref<1024x128xf32, #tpu.memory_space<vmem>>, vector<1024x128xf32>,
    return
  }
  func.func @transform_0(%arg0: i32) -> (i32, i32) {
    %c0_i32 = arith.constant 0 : i32
    %c0_i32_0 = arith.constant 0 : i32
    return %arg0, %c0_i32 : i32, i32
  }
  func.func @transform_1(%arg0: i32) -> (i32, i32) {
    %c0_i32 = arith.constant 0 : i32
    %c0_i32_0 = arith.constant 0 : i32
    return %arg0, %c0_i32 : i32, i32
  }
}

</mosaic_0001>

<bundles_post_ra>
// kernel: tpu_custom_call.1
= control target key start
LH: loop header
LB: loop body
LE: loop exit
PB: predicated region body
PF: predicated region fallthrough
CT: control target
= control target key end

     0   :  { %6 = vsyncpa [#allocation3], 0  ;;  %s1588_s0 = inlined_call_operand.hbm [shape: f32[2048,128], index: 0, kind: input, shape index: {}]   ;;  %s1589_s1 = inlined_call_operand.hbm [shape: f32[2048,128], index: 1, kind: output, shape index: {}]  }
   0x1   :  { %8 = vsyncpa [#allocation3 + $0x1], 0 }
   0x2   :  { %9 = vsyncpa [#allocation4], 0 }
   0x3   :  { %11 = vsyncpa [#allocation4 + $0x1], 0  ;;  %s1169_s6 = smov 0   ;;  %s1171_s7 = smov 0  }
   0x4   :  { %s1173_s8 = smov 0   ;;  %s1175_s9 = smov 0  }
   0x5 LB: > { %s1190_s10 = sadd.s32 4294967295, %s1151_s9   ;;  %s993_s11 = sadd.s32 4294967294, %s1151_s9   ;;  %s1151_s9 = sphi %s1175_s9, %s1604_s9   ;;  %s1147_s8 = sphi %s1173_s8, %s1603_s8   ;;  %s1143_s7 = sphi %s1171_s7, %s1602_s7   ;;  %s1139_s6 = sphi %s1169_s6, %s1601_s6  }
   0x6   : > { %s1194_s12 = sadd.s32 1, %s1151_s9   ;;  %s24_s13 = sadd.s32 1, %s1147_s8 }
   0x7   : > { %s21_s14 = ssub.s32 %s1151_s9, %s1194_s12  ;;  %p31_p0 = scmp.ne.s32.totalorder %s1147_s8, %s1143_s7 }
   0x8   : > { %p22_p1 = scmp.eq.s32.totalorder %s21_s14, 0  ;;  %p32_p2 = scmp.eq.s32.totalorder %s1151_s9, 0 }
   0x9   : > { %p37_p3 = scmp.ne.s32.totalorder %s1143_s7, %s1139_s6  ;;  %p38_p4 = scmp.eq.s32.totalorder %s1190_s10, 0 }
   0xa   : > { %s1206_s15 = scalar_select %p22_p1, %s1147_s8, %s24_s13  }
   0xb   : > { %p1208_p5 = por %p32_p2, %p31_p0  ;;  %p1212_p6 = por %p38_p4, %p37_p3 }
   0xc   : > { %p61_p7 = scmp.eq.s32.totalorder %s1190_s10, 1  ;;  %p67_p8 = scmp.eq.s32.totalorder %s993_s11, 1 }
   0xd   : > { %s1593_s17 = scalar_select %p1212_p6, 1, 0 }
   0xe   : > { %p1021_p10 = scmp.lt.s32.totalorder %s1151_s9, 2  ;;  %p1219_p11 = por %p61_p7, %p31_p0 }
   0xf   : > { %p1223_p12 = por %p67_p8, %p37_p3  ;;  %s87_s20 = sand.u32 1, %s1147_s8  }
  0x10   : > { %s1594_s18 = scalar_select %p1219_p11, 1, 0 }
  0x11   : > { %s1595_s19 = scalar_select %p1223_p12, 1, 0 }
  0x12   : > { %s1007_s21 = sshll.u32 %s1151_s9, 14  ;;  %s996_s22 = sshll.u32 %s87_s20, 10 }
  0x13   : > { %s1232_s25 = scalar_lea.hbm %s1588_s0, %s1007_s21  ;;  %s91_s26 = scalar_lea.vmem [#allocation2], %s996_s22 }
  0x14   : > { %s98_s27 = sshll.u32 %s91_s26, 4  ;;  %p1236_p13 = pnand %p1021_p10, %p1208_p5  ;;  %s1240_s27 = int_to_ptr.vmem [resolvable:$true] %s98_s27 }
  0x15   : > { %s1242_s29 = scalar_lea.sflag [#allocation3], %s87_s20  ;;  %s1059_s30 = scalar_lea.hbm %s1232_s25, 16384 }
  0x16   : > { %p1060_p0 = scmp.ne.s32.totalorder %s1232_s25, %s1059_s30  ;;  %p1061_p1 = pneg %p1236_p13 }
  0x17   : > { %s1064_s4 = scalar_lea.hbm %s1588_s0, 32768  ;;  %p1065_p4 = scmp.lt.s32.totalorder %s1232_s25, %s1588_s0 }
  0x18   : > { %p1062_p2 = pnand %p1061_p1, %p1060_p0  ;;  %p1066_p5 = scmp.lt.s32.totalorder %s1064_s4, %s1059_s30 }
  0x1a   : > { %p1063_p3 = pneg %p1062_p2  ;;  %p1067_p7 = por %p1066_p5, %p1065_p4 }
  0x1c   : > { %p1068_p8 = pnand %p1067_p7, %p1063_p3 }
  0x1e   : > { %1071 = shalt.err (!%p1068_p8)
}
  0x1f   : > { %s1072_s13 = scalar_lea.vmem %s1240_s27, 16384  ;;  %s1153_s14 = smov [#allocation2]  }
  0x20   : > { %p1073_p10 = scmp.ne.s32.totalorder %s1240_s27, %s1072_s13  ;;  %s1077_s16 = sshll.u32 %s1153_s14, 4  ;;  %s1078_s16 = int_to_ptr.vmem [resolvable:$false] %s1077_s16 }
  0x21   : > { %s1079_s20 = scalar_lea.vmem %s1078_s16, 32768  ;;  %p1080_p2 = scmp.lt.s32.totalorder %s1240_s27, %s1078_s16 }
  0x22   : > { %p1075_p9 = pnand %p1073_p10, %p1061_p1  ;;  %p1081_p12 = scmp.lt.s32.totalorder %s1079_s20, %s1072_s13 }
  0x24   : > { %p1076_p0 = pneg %p1075_p9  ;;  %p1082_p11 = por %p1081_p12, %p1080_p2 }
  0x26   : > { %p1083_p6 = pnand %p1082_p11, %p1076_p0 }
  0x28   : > { %1086 = shalt.err (!%p1083_p6)
}
  0x29   : > { %s1154_s21 = smov 128   ;;  %s1155_s22 = smov 8  }
  0x2a   : > { %1016 = dma.hbm_to_vmem [thread:$0]  (!%p1236_p13), %s1232_s25, 16384, %s1240_s27, %s1242_s29, %s1154_s21, %s1154_s21, %s1155_s22  }
  0x2b   : > { %p999_p9 = scmp.ge.s32.totalorder %s1151_s9, 1  ;;  %p106_p1 = scmp.lt.s32.totalorder %s1151_s9, 3 }
  0x2d   : > { %p107_p3 = pnand %p999_p9, %p106_p1 }
  0x2e   : > { %s1266_s23 = sand.u32 (!%p107_p3), 1, %s1143_s7   ;;  %p1597_p6 = scmp.ne.s32.totalorder (!%p107_p3), %s1593_s17, 0 }
  0x2f   : > { %110 = sbr.rel (%p107_p3) target bundleno = 225 (0xe1), region = 24  ;;  %s1000_s24 = sshll.u32 (!%p107_p3), %s1266_s23, 10 }
  0x30   : > { %s113_s26 = scalar_lea.sflag (!%p107_p3), [#allocation3], %s1266_s23  ;;  %s1272_s30 = scalar_lea.vmem (!%p107_p3), [#allocation2], %s1000_s24 }
  0x34   : > { %1130 = dma.done.wait (%p1597_p6), %s113_s26, 16384  }
  0x35   : > { %1132 = vsyncadd (%p1597_p6), %s113_s26, 4294950912  ;;  %v137_v0 = vld [vmem:[%s1272_s30] sm:$0xff]  ;;  %v138_v1 = vld [vmem:[%s1272_s30 + $0x8] sm:$0xff]  ;;  %s1294_s17 = scalar_lea.vmem [#allocation5], %s1000_s24  ;;  %s1008_s25 = sshll.u32 %s1190_s10, 14 }
  0x36   : > { %v139_v2 = vld [vmem:[%s1272_s30 + $0x10] sm:$0xff]  ;;  %v265_v3 = vadd.f32 3.0, %v137_v0  ;;  %v266_v4 = vadd.f32 3.0, %v138_v1  ;;  %v140_v6 = vld [vmem:[%s1272_s30 + $0x18] sm:$0xff]  ;;  %v141_v7 = vld [vmem:[%s1272_s30 + $0x20] sm:$0xff]  ;;  %s920_s27 = sshll.u32 %s1294_s17, 4  ;;  %s1541_s29 = scalar_lea.hbm %s1589_s1, %s1008_s25  ;;  %s1543_s27 = int_to_ptr.vmem [resolvable:$true] %s920_s27 }
  0x37   : > { %v267_v5 = vadd.f32 3.0, %v139_v2  ;;  %v142_v8 = vld [vmem:[%s1272_s30 + $0x28] sm:$0xff]  ;;  %v268_v9 = vadd.f32 3.0, %v140_v6  ;;  %v269_v10 = vadd.f32 3.0, %v141_v7  ;;  %v143_v12 = vld [vmem:[%s1272_s30 + $0x30] sm:$0xff]  ;;  %v144_v13 = vld [vmem:[%s1272_s30 + $0x38] sm:$0xff] }
  0x38   : > { %v270_v11 = vadd.f32 3.0, %v142_v8  ;;  %v393_v14 = vmax.f32 %v265_v3, 0.0  ;;  %v394_v15 = vmax.f32 %v266_v4, 0.0  ;;  %v271_v17 = vadd.f32 3.0, %v143_v12  ;;  %v145_v22 = vld [vmem:[%s1272_s30 + $0x40] sm:$0xff]  ;;  %v146_v23 = vld [vmem:[%s1272_s30 + $0x48] sm:$0xff] }
  0x39   : > { %v395_v16 = vmax.f32 %v267_v5, 0.0  ;;  %v396_v18 = vmax.f32 %v268_v9, 0.0  ;;  %v397_v19 = vmax.f32 %v269_v10, 0.0  ;;  %v272_v21 = vadd.f32 3.0, %v144_v13  ;;  %v147_v28 = vld [vmem:[%s1272_s30 + $0x50] sm:$0xff]  ;;  %v148_v29 = vld [vmem:[%s1272_s30 + $0x58] sm:$0xff] }
  0x3a   : > { %v398_v20 = vmax.f32 %v270_v11, 0.0  ;;  %v521_v24 = vmin.f32 %v393_v14, 6.0  ;;  %v522_v25 = vmin.f32 %v394_v15, 6.0  ;;  %v399_v27 = vmax.f32 %v271_v17, 0.0  ;;  %v149_v34 = vld [vmem:[%s1272_s30 + $0x60] sm:$0xff]  ;;  %v150_v35 = vld [vmem:[%s1272_s30 + $0x68] sm:$0xff] }
  0x3b   : > { %v523_v26 = vmin.f32 %v395_v16, 6.0  ;;  %v524_v30 = vmin.f32 %v396_v18, 6.0  ;;  %v525_v31 = vmin.f32 %v397_v19, 6.0  ;;  %v400_v33 = vmax.f32 %v272_v21, 0.0  ;;  %v151_v50 = vld [vmem:[%s1272_s30 + $0x70] sm:$0xff]  ;;  %v152_v51 = vld [vmem:[%s1272_s30 + $0x78] sm:$0xff] }
  0x3c   : > { %v526_v32 = vmin.f32 %v398_v20, 6.0  ;;  %v650_v36 = vmul.f32 0.16666667, %v521_v24  ;;  %v651_v37 = vmul.f32 0.16666667, %v522_v25  ;;  %v527_v42 = vmin.f32 %v399_v27, 6.0 }
  0x3d   : > { %v652_v38 = vmul.f32 0.16666667, %v523_v26  ;;  %v653_v39 = vmul.f32 0.16666667, %v524_v30  ;;  %v654_v40 = vmul.f32 0.16666667, %v525_v31 }
  0x3e   : > { %v655_v41 = vmul.f32 0.16666667, %v526_v32  ;;  %778 = vst [vmem:[%s1294_s17] sm:$0xff] %v650_v36  ;;  %779 = vst [vmem:[%s1294_s17 + $0x8] sm:$0xff] %v651_v37  ;;  %v528_v43 = vmin.f32 %v400_v33, 6.0  ;;  %v273_v44 = vadd.f32 3.0, %v145_v22  ;;  %v274_v45 = vadd.f32 3.0, %v146_v23 }
  0x3f   : > { %780 = vst [vmem:[%s1294_s17 + $0x10] sm:$0xff] %v652_v38  ;;  %781 = vst [vmem:[%s1294_s17 + $0x18] sm:$0xff] %v653_v39  ;;  %v275_v46 = vadd.f32 3.0, %v147_v28  ;;  %v276_v47 = vadd.f32 3.0, %v148_v29  ;;  %v277_v48 = vadd.f32 3.0, %v149_v34  ;;  %v278_v49 = vadd.f32 3.0, %v150_v35 }
  0x40   : > { %782 = vst [vmem:[%s1294_s17 + $0x20] sm:$0xff] %v654_v40  ;;  %783 = vst [vmem:[%s1294_s17 + $0x28] sm:$0xff] %v655_v41  ;;  %v656_v52 = vmul.f32 0.16666667, %v527_v42  ;;  %v657_v53 = vmul.f32 0.16666667, %v528_v43 }
  0x41   : > { %v401_v54 = vmax.f32 %v273_v44, 0.0  ;;  %v402_v55 = vmax.f32 %v274_v45, 0.0  ;;  %v403_v56 = vmax.f32 %v275_v46, 0.0  ;;  %v404_v57 = vmax.f32 %v276_v47, 0.0  ;;  %v153_v60 = vld [vmem:[%s1272_s30 + $0x80] sm:$0xff]  ;;  %v154_v1 = vld [vmem:[%s1272_s30 + $0x88] sm:$0xff] }
  0x42   : > { %v405_v58 = vmax.f32 %v277_v48, 0.0  ;;  %v406_v59 = vmax.f32 %v278_v49, 0.0  ;;  %784 = vst [vmem:[%s1294_s17 + $0x30] sm:$0xff] %v656_v52  ;;  %785 = vst [vmem:[%s1294_s17 + $0x38] sm:$0xff] %v657_v53  ;;  %v279_v63 = vadd.f32 3.0, %v151_v50  ;;  %v280_v0 = vadd.f32 3.0, %v152_v51 }
  0x43   : > { %v529_v61 = vmin.f32 %v401_v54, 6.0  ;;  %v530_v62 = vmin.f32 %v402_v55, 6.0  ;;  %v155_v2 = vld [vmem:[%s1272_s30 + $0x90] sm:$0xff]  ;;  %v156_v3 = vld [vmem:[%s1272_s30 + $0x98] sm:$0xff]  ;;  %v531_v4 = vmin.f32 %v403_v56, 6.0  ;;  %v532_v5 = vmin.f32 %v404_v57, 6.0 }
  0x44   : > { %v533_v6 = vmin.f32 %v405_v58, 6.0  ;;  %v534_v7 = vmin.f32 %v406_v59, 6.0  ;;  %v157_v8 = vld [vmem:[%s1272_s30 + $0xa0] sm:$0xff]  ;;  %v158_v9 = vld [vmem:[%s1272_s30 + $0xa8] sm:$0xff]  ;;  %v407_v12 = vmax.f32 %v279_v63, 0.0  ;;  %v408_v13 = vmax.f32 %v280_v0, 0.0 }
  0x45   : > { %v658_v10 = vmul.f32 0.16666667, %v529_v61  ;;  %v659_v11 = vmul.f32 0.16666667, %v530_v62  ;;  %v660_v14 = vmul.f32 0.16666667, %v531_v4 }
  0x46   : > { %v661_v15 = vmul.f32 0.16666667, %v532_v5  ;;  %v662_v16 = vmul.f32 0.16666667, %v533_v6  ;;  %v663_v17 = vmul.f32 0.16666667, %v534_v7 }
  0x47   : > { %786 = vst [vmem:[%s1294_s17 + $0x40] sm:$0xff] %v658_v10  ;;  %787 = vst [vmem:[%s1294_s17 + $0x48] sm:$0xff] %v659_v11  ;;  %v535_v18 = vmin.f32 %v407_v12, 6.0  ;;  %v536_v19 = vmin.f32 %v408_v13, 6.0  ;;  %v281_v20 = vadd.f32 3.0, %v153_v60  ;;  %v282_v21 = vadd.f32 3.0, %v154_v1 }
  0x48   : > { %788 = vst [vmem:[%s1294_s17 + $0x50] sm:$0xff] %v660_v14  ;;  %789 = vst [vmem:[%s1294_s17 + $0x58] sm:$0xff] %v661_v15  ;;  %v283_v22 = vadd.f32 3.0, %v155_v2  ;;  %v284_v23 = vadd.f32 3.0, %v156_v3  ;;  %v285_v24 = vadd.f32 3.0, %v157_v8  ;;  %v159_v25 = vld [vmem:[%s1272_s30 + $0xb0] sm:$0xff] }
  0x49   : > { %790 = vst [vmem:[%s1294_s17 + $0x60] sm:$0xff] %v662_v16  ;;  %v160_v26 = vld [vmem:[%s1272_s30 + $0xb8] sm:$0xff]  ;;  %791 = vst [vmem:[%s1294_s17 + $0x68] sm:$0xff] %v663_v17  ;;  %v664_v27 = vmul.f32 0.16666667, %v535_v18  ;;  %v409_v29 = vmax.f32 %v281_v20, 0.0 }
  0x4a   : > { %v665_v28 = vmul.f32 0.16666667, %v536_v19  ;;  %v286_v30 = vadd.f32 3.0, %v158_v9  ;;  %v410_v31 = vmax.f32 %v282_v21, 0.0  ;;  %v411_v32 = vmax.f32 %v283_v22, 0.0  ;;  %v161_v39 = vld [vmem:[%s1272_s30 + $0xc0] sm:$0xff] }
  0x4b   : > { %v412_v33 = vmax.f32 %v284_v23, 0.0  ;;  %v413_v34 = vmax.f32 %v285_v24, 0.0  ;;  %792 = vst [vmem:[%s1294_s17 + $0x70] sm:$0xff] %v664_v27  ;;  %v537_v35 = vmin.f32 %v409_v29, 6.0  ;;  %v287_v37 = vadd.f32 3.0, %v159_v25  ;;  %v162_v40 = vld [vmem:[%s1272_s30 + $0xc8] sm:$0xff] }
  0x4c   : > { %793 = vst [vmem:[%s1294_s17 + $0x78] sm:$0xff] %v665_v28  ;;  %v414_v36 = vmax.f32 %v286_v30, 0.0  ;;  %v288_v38 = vadd.f32 3.0, %v160_v26  ;;  %v163_v41 = vld [vmem:[%s1272_s30 + $0xd0] sm:$0xff]  ;;  %v538_v42 = vmin.f32 %v410_v31, 6.0  ;;  %v539_v43 = vmin.f32 %v411_v32, 6.0 }
  0x4d   : > { %v540_v44 = vmin.f32 %v412_v33, 6.0  ;;  %v541_v45 = vmin.f32 %v413_v34, 6.0  ;;  %v164_v46 = vld [vmem:[%s1272_s30 + $0xd8] sm:$0xff]  ;;  %v165_v47 = vld [vmem:[%s1272_s30 + $0xe0] sm:$0xff]  ;;  %v666_v48 = vmul.f32 0.16666667, %v537_v35 }
  0x4e   : > { %v542_v49 = vmin.f32 %v414_v36, 6.0  ;;  %v415_v50 = vmax.f32 %v287_v37, 0.0  ;;  %v416_v51 = vmax.f32 %v288_v38, 0.0  ;;  %v166_v52 = vld [vmem:[%s1272_s30 + $0xe8] sm:$0xff]  ;;  %v667_v53 = vmul.f32 0.16666667, %v538_v42 }
  0x4f   : > { %v668_v54 = vmul.f32 0.16666667, %v539_v43  ;;  %v669_v55 = vmul.f32 0.16666667, %v540_v44  ;;  %794 = vst [vmem:[%s1294_s17 + $0x80] sm:$0xff] %v666_v48  ;;  %v289_v60 = vadd.f32 3.0, %v161_v39 }
  0x50   : > { %v670_v56 = vmul.f32 0.16666667, %v541_v45  ;;  %v671_v57 = vmul.f32 0.16666667, %v542_v49  ;;  %v543_v58 = vmin.f32 %v415_v50, 6.0  ;;  %v544_v59 = vmin.f32 %v416_v51, 6.0 }
  0x51   : > { %795 = vst [vmem:[%s1294_s17 + $0x88] sm:$0xff] %v667_v53  ;;  %796 = vst [vmem:[%s1294_s17 + $0x90] sm:$0xff] %v668_v54  ;;  %v290_v61 = vadd.f32 3.0, %v162_v40  ;;  %v291_v62 = vadd.f32 3.0, %v163_v41  ;;  %v292_v63 = vadd.f32 3.0, %v164_v46  ;;  %v167_v0 = vld [vmem:[%s1272_s30 + $0xf0] sm:$0xff] }
  0x52   : > { %797 = vst [vmem:[%s1294_s17 + $0x98] sm:$0xff] %v669_v55  ;;  %v168_v1 = vld [vmem:[%s1272_s30 + $0xf8] sm:$0xff]  ;;  %798 = vst [vmem:[%s1294_s17 + $0xa0] sm:$0xff] %v670_v56  ;;  %v672_v2 = vmul.f32 0.16666667, %v543_v58  ;;  %v293_v4 = vadd.f32 3.0, %v165_v47 }
  0x53   : > { %799 = vst [vmem:[%s1294_s17 + $0xa8] sm:$0xff] %v671_v57  ;;  %v673_v3 = vmul.f32 0.16666667, %v544_v59  ;;  %v294_v5 = vadd.f32 3.0, %v166_v52  ;;  %v417_v6 = vmax.f32 %v289_v60, 0.0  ;;  %v418_v7 = vmax.f32 %v290_v61, 0.0 }
  0x54   : > { %v419_v8 = vmax.f32 %v291_v62, 0.0  ;;  %v420_v9 = vmax.f32 %v292_v63, 0.0  ;;  %800 = vst [vmem:[%s1294_s17 + $0xb0] sm:$0xff] %v672_v2  ;;  %v421_v10 = vmax.f32 %v293_v4, 0.0  ;;  %v295_v12 = vadd.f32 3.0, %v167_v0  ;;  %v169_v14 = vld [vmem:[%s1272_s30 + $0x100] sm:$0xff] }
  0x55   : > { %801 = vst [vmem:[%s1294_s17 + $0xb8] sm:$0xff] %v673_v3  ;;  %v422_v11 = vmax.f32 %v294_v5, 0.0  ;;  %v296_v13 = vadd.f32 3.0, %v168_v1  ;;  %v170_v15 = vld [vmem:[%s1272_s30 + $0x108] sm:$0xff]  ;;  %v545_v16 = vmin.f32 %v417_v6, 6.0  ;;  %v546_v17 = vmin.f32 %v418_v7, 6.0 }
  0x56   : > { %v547_v18 = vmin.f32 %v419_v8, 6.0  ;;  %v548_v19 = vmin.f32 %v420_v9, 6.0  ;;  %v171_v20 = vld [vmem:[%s1272_s30 + $0x110] sm:$0xff]  ;;  %v172_v21 = vld [vmem:[%s1272_s30 + $0x118] sm:$0xff]  ;;  %v549_v22 = vmin.f32 %v421_v10, 6.0  ;;  %v423_v24 = vmax.f32 %v295_v12, 0.0 }
  0x57   : > { %v550_v23 = vmin.f32 %v422_v11, 6.0  ;;  %v424_v25 = vmax.f32 %v296_v13, 0.0  ;;  %v173_v26 = vld [vmem:[%s1272_s30 + $0x120] sm:$0xff]  ;;  %v174_v27 = vld [vmem:[%s1272_s30 + $0x128] sm:$0xff]  ;;  %v674_v28 = vmul.f32 0.16666667, %v545_v16 }
  0x58   : > { %v675_v29 = vmul.f32 0.16666667, %v546_v17  ;;  %v676_v30 = vmul.f32 0.16666667, %v547_v18  ;;  %v677_v31 = vmul.f32 0.16666667, %v548_v19 }
  0x59   : > { %v678_v32 = vmul.f32 0.16666667, %v549_v22  ;;  %v679_v33 = vmul.f32 0.16666667, %v550_v23  ;;  %802 = vst [vmem:[%s1294_s17 + $0xc0] sm:$0xff] %v674_v28  ;;  %v551_v34 = vmin.f32 %v423_v24, 6.0 }
  0x5a   : > { %803 = vst [vmem:[%s1294_s17 + $0xc8] sm:$0xff] %v675_v29  ;;  %804 = vst [vmem:[%s1294_s17 + $0xd0] sm:$0xff] %v676_v30  ;;  %v552_v35 = vmin.f32 %v424_v25, 6.0  ;;  %v297_v36 = vadd.f32 3.0, %v169_v14  ;;  %v298_v37 = vadd.f32 3.0, %v170_v15  ;;  %v299_v38 = vadd.f32 3.0, %v171_v20 }
  0x5b   : > { %805 = vst [vmem:[%s1294_s17 + $0xd8] sm:$0xff] %v677_v31  ;;  %806 = vst [vmem:[%s1294_s17 + $0xe0] sm:$0xff] %v678_v32  ;;  %v300_v39 = vadd.f32 3.0, %v172_v21  ;;  %v301_v40 = vadd.f32 3.0, %v173_v26  ;;  %v302_v41 = vadd.f32 3.0, %v174_v27  ;;  %v175_v42 = vld [vmem:[%s1272_s30 + $0x130] sm:$0xff] }
  0x5c   : > { %807 = vst [vmem:[%s1294_s17 + $0xe8] sm:$0xff] %v679_v33  ;;  %v176_v43 = vld [vmem:[%s1272_s30 + $0x138] sm:$0xff]  ;;  %v680_v44 = vmul.f32 0.16666667, %v551_v34  ;;  %v681_v45 = vmul.f32 0.16666667, %v552_v35 }
  0x5d   : > { %v425_v46 = vmax.f32 %v297_v36, 0.0  ;;  %v426_v47 = vmax.f32 %v298_v37, 0.0  ;;  %v427_v48 = vmax.f32 %v299_v38, 0.0  ;;  %v428_v49 = vmax.f32 %v300_v39, 0.0  ;;  %v177_v52 = vld [vmem:[%s1272_s30 + $0x140] sm:$0xff]  ;;  %v178_v57 = vld [vmem:[%s1272_s30 + $0x148] sm:$0xff] }
  0x5e   : > { %v429_v50 = vmax.f32 %v301_v40, 0.0  ;;  %v430_v51 = vmax.f32 %v302_v41, 0.0  ;;  %808 = vst [vmem:[%s1294_s17 + $0xf0] sm:$0xff] %v680_v44  ;;  %809 = vst [vmem:[%s1294_s17 + $0xf8] sm:$0xff] %v681_v45  ;;  %v303_v55 = vadd.f32 3.0, %v175_v42  ;;  %v304_v56 = vadd.f32 3.0, %v176_v43 }
  0x5f   : > { %v553_v53 = vmin.f32 %v425_v46, 6.0  ;;  %v554_v54 = vmin.f32 %v426_v47, 6.0  ;;  %v179_v58 = vld [vmem:[%s1272_s30 + $0x150] sm:$0xff]  ;;  %v180_v59 = vld [vmem:[%s1272_s30 + $0x158] sm:$0xff]  ;;  %v555_v60 = vmin.f32 %v427_v48, 6.0  ;;  %v556_v61 = vmin.f32 %v428_v49, 6.0 }
  0x60   : > { %v557_v62 = vmin.f32 %v429_v50, 6.0  ;;  %v558_v63 = vmin.f32 %v430_v51, 6.0  ;;  %v181_v0 = vld [vmem:[%s1272_s30 + $0x160] sm:$0xff]  ;;  %v182_v1 = vld [vmem:[%s1272_s30 + $0x168] sm:$0xff]  ;;  %v431_v4 = vmax.f32 %v303_v55, 0.0  ;;  %v432_v5 = vmax.f32 %v304_v56, 0.0 }
  0x61   : > { %v682_v2 = vmul.f32 0.16666667, %v553_v53  ;;  %v683_v3 = vmul.f32 0.16666667, %v554_v54  ;;  %v684_v6 = vmul.f32 0.16666667, %v555_v60 }
  0x62   : > { %v685_v7 = vmul.f32 0.16666667, %v556_v61  ;;  %v686_v8 = vmul.f32 0.16666667, %v557_v62  ;;  %v687_v9 = vmul.f32 0.16666667, %v558_v63 }
  0x63   : > { %810 = vst [vmem:[%s1294_s17 + $0x100] sm:$0xff] %v682_v2  ;;  %811 = vst [vmem:[%s1294_s17 + $0x108] sm:$0xff] %v683_v3  ;;  %v559_v10 = vmin.f32 %v431_v4, 6.0  ;;  %v560_v11 = vmin.f32 %v432_v5, 6.0  ;;  %v305_v12 = vadd.f32 3.0, %v177_v52  ;;  %v306_v13 = vadd.f32 3.0, %v178_v57 }
  0x64   : > { %812 = vst [vmem:[%s1294_s17 + $0x110] sm:$0xff] %v684_v6  ;;  %813 = vst [vmem:[%s1294_s17 + $0x118] sm:$0xff] %v685_v7  ;;  %v307_v14 = vadd.f32 3.0, %v179_v58  ;;  %v308_v15 = vadd.f32 3.0, %v180_v59  ;;  %v309_v16 = vadd.f32 3.0, %v181_v0  ;;  %v183_v17 = vld [vmem:[%s1272_s30 + $0x170] sm:$0xff] }
  0x65   : > { %814 = vst [vmem:[%s1294_s17 + $0x120] sm:$0xff] %v686_v8  ;;  %v184_v18 = vld [vmem:[%s1272_s30 + $0x178] sm:$0xff]  ;;  %815 = vst [vmem:[%s1294_s17 + $0x128] sm:$0xff] %v687_v9  ;;  %v688_v19 = vmul.f32 0.16666667, %v559_v10  ;;  %v433_v21 = vmax.f32 %v305_v12, 0.0 }
  0x66   : > { %v689_v20 = vmul.f32 0.16666667, %v560_v11  ;;  %v310_v22 = vadd.f32 3.0, %v182_v1  ;;  %v434_v23 = vmax.f32 %v306_v13, 0.0  ;;  %v435_v24 = vmax.f32 %v307_v14, 0.0  ;;  %v185_v31 = vld [vmem:[%s1272_s30 + $0x180] sm:$0xff] }
  0x67   : > { %v436_v25 = vmax.f32 %v308_v15, 0.0  ;;  %v437_v26 = vmax.f32 %v309_v16, 0.0  ;;  %816 = vst [vmem:[%s1294_s17 + $0x130] sm:$0xff] %v688_v19  ;;  %v561_v27 = vmin.f32 %v433_v21, 6.0  ;;  %v311_v29 = vadd.f32 3.0, %v183_v17  ;;  %v186_v32 = vld [vmem:[%s1272_s30 + $0x188] sm:$0xff] }
  0x68   : > { %817 = vst [vmem:[%s1294_s17 + $0x138] sm:$0xff] %v689_v20  ;;  %v438_v28 = vmax.f32 %v310_v22, 0.0  ;;  %v312_v30 = vadd.f32 3.0, %v184_v18  ;;  %v187_v33 = vld [vmem:[%s1272_s30 + $0x190] sm:$0xff]  ;;  %v562_v34 = vmin.f32 %v434_v23, 6.0  ;;  %v563_v35 = vmin.f32 %v435_v24, 6.0 }
  0x69   : > { %v564_v36 = vmin.f32 %v436_v25, 6.0  ;;  %v565_v37 = vmin.f32 %v437_v26, 6.0  ;;  %v188_v38 = vld [vmem:[%s1272_s30 + $0x198] sm:$0xff]  ;;  %v189_v39 = vld [vmem:[%s1272_s30 + $0x1a0] sm:$0xff]  ;;  %v690_v40 = vmul.f32 0.16666667, %v561_v27 }
  0x6a   : > { %v566_v41 = vmin.f32 %v438_v28, 6.0  ;;  %v439_v42 = vmax.f32 %v311_v29, 0.0  ;;  %v440_v43 = vmax.f32 %v312_v30, 0.0  ;;  %v190_v44 = vld [vmem:[%s1272_s30 + $0x1a8] sm:$0xff]  ;;  %v691_v45 = vmul.f32 0.16666667, %v562_v34 }
  0x6b   : > { %v692_v46 = vmul.f32 0.16666667, %v563_v35  ;;  %v693_v47 = vmul.f32 0.16666667, %v564_v36  ;;  %818 = vst [vmem:[%s1294_s17 + $0x140] sm:$0xff] %v690_v40  ;;  %v313_v52 = vadd.f32 3.0, %v185_v31 }
  0x6c   : > { %v694_v48 = vmul.f32 0.16666667, %v565_v37  ;;  %v695_v49 = vmul.f32 0.16666667, %v566_v41  ;;  %v567_v50 = vmin.f32 %v439_v42, 6.0  ;;  %v568_v51 = vmin.f32 %v440_v43, 6.0 }
  0x6d   : > { %819 = vst [vmem:[%s1294_s17 + $0x148] sm:$0xff] %v691_v45  ;;  %820 = vst [vmem:[%s1294_s17 + $0x150] sm:$0xff] %v692_v46  ;;  %v314_v53 = vadd.f32 3.0, %v186_v32  ;;  %v315_v54 = vadd.f32 3.0, %v187_v33  ;;  %v316_v55 = vadd.f32 3.0, %v188_v38  ;;  %v191_v56 = vld [vmem:[%s1272_s30 + $0x1b0] sm:$0xff] }
  0x6e   : > { %821 = vst [vmem:[%s1294_s17 + $0x158] sm:$0xff] %v693_v47  ;;  %v192_v57 = vld [vmem:[%s1272_s30 + $0x1b8] sm:$0xff]  ;;  %822 = vst [vmem:[%s1294_s17 + $0x160] sm:$0xff] %v694_v48  ;;  %v696_v58 = vmul.f32 0.16666667, %v567_v50  ;;  %v317_v60 = vadd.f32 3.0, %v189_v39 }
  0x6f   : > { %823 = vst [vmem:[%s1294_s17 + $0x168] sm:$0xff] %v695_v49  ;;  %v697_v59 = vmul.f32 0.16666667, %v568_v51  ;;  %v318_v61 = vadd.f32 3.0, %v190_v44  ;;  %v441_v62 = vmax.f32 %v313_v52, 0.0  ;;  %v442_v63 = vmax.f32 %v314_v53, 0.0 }
  0x70   : > { %v443_v0 = vmax.f32 %v315_v54, 0.0  ;;  %v444_v1 = vmax.f32 %v316_v55, 0.0  ;;  %824 = vst [vmem:[%s1294_s17 + $0x170] sm:$0xff] %v696_v58  ;;  %v445_v2 = vmax.f32 %v317_v60, 0.0  ;;  %v319_v4 = vadd.f32 3.0, %v191_v56  ;;  %v193_v6 = vld [vmem:[%s1272_s30 + $0x1c0] sm:$0xff] }
  0x71   : > { %825 = vst [vmem:[%s1294_s17 + $0x178] sm:$0xff] %v697_v59  ;;  %v446_v3 = vmax.f32 %v318_v61, 0.0  ;;  %v320_v5 = vadd.f32 3.0, %v192_v57  ;;  %v194_v7 = vld [vmem:[%s1272_s30 + $0x1c8] sm:$0xff]  ;;  %v569_v8 = vmin.f32 %v441_v62, 6.0  ;;  %v570_v9 = vmin.f32 %v442_v63, 6.0 }
  0x72   : > { %v571_v10 = vmin.f32 %v443_v0, 6.0  ;;  %v572_v11 = vmin.f32 %v444_v1, 6.0  ;;  %v195_v12 = vld [vmem:[%s1272_s30 + $0x1d0] sm:$0xff]  ;;  %v196_v13 = vld [vmem:[%s1272_s30 + $0x1d8] sm:$0xff]  ;;  %v573_v14 = vmin.f32 %v445_v2, 6.0  ;;  %v447_v16 = vmax.f32 %v319_v4, 0.0 }
  0x73   : > { %v574_v15 = vmin.f32 %v446_v3, 6.0  ;;  %v448_v17 = vmax.f32 %v320_v5, 0.0  ;;  %v197_v18 = vld [vmem:[%s1272_s30 + $0x1e0] sm:$0xff]  ;;  %v198_v19 = vld [vmem:[%s1272_s30 + $0x1e8] sm:$0xff]  ;;  %v698_v20 = vmul.f32 0.16666667, %v569_v8 }
  0x74   : > { %v699_v21 = vmul.f32 0.16666667, %v570_v9  ;;  %v700_v22 = vmul.f32 0.16666667, %v571_v10  ;;  %v701_v23 = vmul.f32 0.16666667, %v572_v11 }
  0x75   : > { %v702_v24 = vmul.f32 0.16666667, %v573_v14  ;;  %v703_v25 = vmul.f32 0.16666667, %v574_v15  ;;  %826 = vst [vmem:[%s1294_s17 + $0x180] sm:$0xff] %v698_v20  ;;  %v575_v26 = vmin.f32 %v447_v16, 6.0 }
  0x76   : > { %827 = vst [vmem:[%s1294_s17 + $0x188] sm:$0xff] %v699_v21  ;;  %828 = vst [vmem:[%s1294_s17 + $0x190] sm:$0xff] %v700_v22  ;;  %v576_v27 = vmin.f32 %v448_v17, 6.0  ;;  %v321_v28 = vadd.f32 3.0, %v193_v6  ;;  %v322_v29 = vadd.f32 3.0, %v194_v7  ;;  %v323_v30 = vadd.f32 3.0, %v195_v12 }
  0x77   : > { %829 = vst [vmem:[%s1294_s17 + $0x198] sm:$0xff] %v701_v23  ;;  %830 = vst [vmem:[%s1294_s17 + $0x1a0] sm:$0xff] %v702_v24  ;;  %v324_v31 = vadd.f32 3.0, %v196_v13  ;;  %v325_v32 = vadd.f32 3.0, %v197_v18  ;;  %v326_v33 = vadd.f32 3.0, %v198_v19  ;;  %v199_v34 = vld [vmem:[%s1272_s30 + $0x1f0] sm:$0xff] }
  0x78   : > { %831 = vst [vmem:[%s1294_s17 + $0x1a8] sm:$0xff] %v703_v25  ;;  %v200_v35 = vld [vmem:[%s1272_s30 + $0x1f8] sm:$0xff]  ;;  %v704_v36 = vmul.f32 0.16666667, %v575_v26  ;;  %v705_v37 = vmul.f32 0.16666667, %v576_v27 }
  0x79   : > { %v449_v38 = vmax.f32 %v321_v28, 0.0  ;;  %v450_v39 = vmax.f32 %v322_v29, 0.0  ;;  %v451_v40 = vmax.f32 %v323_v30, 0.0  ;;  %v452_v41 = vmax.f32 %v324_v31, 0.0  ;;  %v201_v44 = vld [vmem:[%s1272_s30 + $0x200] sm:$0xff]  ;;  %v202_v49 = vld [vmem:[%s1272_s30 + $0x208] sm:$0xff] }
  0x7a   : > { %v453_v42 = vmax.f32 %v325_v32, 0.0  ;;  %v454_v43 = vmax.f32 %v326_v33, 0.0  ;;  %832 = vst [vmem:[%s1294_s17 + $0x1b0] sm:$0xff] %v704_v36  ;;  %833 = vst [vmem:[%s1294_s17 + $0x1b8] sm:$0xff] %v705_v37  ;;  %v327_v47 = vadd.f32 3.0, %v199_v34  ;;  %v328_v48 = vadd.f32 3.0, %v200_v35 }
  0x7b   : > { %v577_v45 = vmin.f32 %v449_v38, 6.0  ;;  %v578_v46 = vmin.f32 %v450_v39, 6.0  ;;  %v203_v50 = vld [vmem:[%s1272_s30 + $0x210] sm:$0xff]  ;;  %v204_v51 = vld [vmem:[%s1272_s30 + $0x218] sm:$0xff]  ;;  %v579_v52 = vmin.f32 %v451_v40, 6.0  ;;  %v580_v53 = vmin.f32 %v452_v41, 6.0 }
  0x7c   : > { %v581_v54 = vmin.f32 %v453_v42, 6.0  ;;  %v582_v55 = vmin.f32 %v454_v43, 6.0  ;;  %v205_v56 = vld [vmem:[%s1272_s30 + $0x220] sm:$0xff]  ;;  %v206_v57 = vld [vmem:[%s1272_s30 + $0x228] sm:$0xff]  ;;  %v455_v60 = vmax.f32 %v327_v47, 0.0  ;;  %v456_v61 = vmax.f32 %v328_v48, 0.0 }
  0x7d   : > { %v706_v58 = vmul.f32 0.16666667, %v577_v45  ;;  %v707_v59 = vmul.f32 0.16666667, %v578_v46  ;;  %v708_v62 = vmul.f32 0.16666667, %v579_v52 }
  0x7e   : > { %v709_v63 = vmul.f32 0.16666667, %v580_v53  ;;  %v710_v0 = vmul.f32 0.16666667, %v581_v54  ;;  %v711_v1 = vmul.f32 0.16666667, %v582_v55 }
  0x7f   : > { %834 = vst [vmem:[%s1294_s17 + $0x1c0] sm:$0xff] %v706_v58  ;;  %835 = vst [vmem:[%s1294_s17 + $0x1c8] sm:$0xff] %v707_v59  ;;  %v583_v2 = vmin.f32 %v455_v60, 6.0  ;;  %v584_v3 = vmin.f32 %v456_v61, 6.0  ;;  %v329_v4 = vadd.f32 3.0, %v201_v44  ;;  %v330_v5 = vadd.f32 3.0, %v202_v49 }
  0x80   : > { %836 = vst [vmem:[%s1294_s17 + $0x1d0] sm:$0xff] %v708_v62  ;;  %837 = vst [vmem:[%s1294_s17 + $0x1d8] sm:$0xff] %v709_v63  ;;  %v331_v6 = vadd.f32 3.0, %v203_v50  ;;  %v332_v7 = vadd.f32 3.0, %v204_v51  ;;  %v333_v8 = vadd.f32 3.0, %v205_v56  ;;  %v207_v9 = vld [vmem:[%s1272_s30 + $0x230] sm:$0xff] }
  0x81   : > { %838 = vst [vmem:[%s1294_s17 + $0x1e0] sm:$0xff] %v710_v0  ;;  %v208_v10 = vld [vmem:[%s1272_s30 + $0x238] sm:$0xff]  ;;  %839 = vst [vmem:[%s1294_s17 + $0x1e8] sm:$0xff] %v711_v1  ;;  %v712_v11 = vmul.f32 0.16666667, %v583_v2  ;;  %v457_v13 = vmax.f32 %v329_v4, 0.0 }
  0x82   : > { %v713_v12 = vmul.f32 0.16666667, %v584_v3  ;;  %v334_v14 = vadd.f32 3.0, %v206_v57  ;;  %v458_v15 = vmax.f32 %v330_v5, 0.0  ;;  %v459_v16 = vmax.f32 %v331_v6, 0.0  ;;  %v209_v23 = vld [vmem:[%s1272_s30 + $0x240] sm:$0xff] }
  0x83   : > { %v460_v17 = vmax.f32 %v332_v7, 0.0  ;;  %v461_v18 = vmax.f32 %v333_v8, 0.0  ;;  %840 = vst [vmem:[%s1294_s17 + $0x1f0] sm:$0xff] %v712_v11  ;;  %v585_v19 = vmin.f32 %v457_v13, 6.0  ;;  %v335_v21 = vadd.f32 3.0, %v207_v9  ;;  %v210_v24 = vld [vmem:[%s1272_s30 + $0x248] sm:$0xff] }
  0x84   : > { %841 = vst [vmem:[%s1294_s17 + $0x1f8] sm:$0xff] %v713_v12  ;;  %v462_v20 = vmax.f32 %v334_v14, 0.0  ;;  %v336_v22 = vadd.f32 3.0, %v208_v10  ;;  %v211_v25 = vld [vmem:[%s1272_s30 + $0x250] sm:$0xff]  ;;  %v586_v26 = vmin.f32 %v458_v15, 6.0  ;;  %v587_v27 = vmin.f32 %v459_v16, 6.0 }
  0x85   : > { %v588_v28 = vmin.f32 %v460_v17, 6.0  ;;  %v589_v29 = vmin.f32 %v461_v18, 6.0  ;;  %v212_v30 = vld [vmem:[%s1272_s30 + $0x258] sm:$0xff]  ;;  %v213_v31 = vld [vmem:[%s1272_s30 + $0x260] sm:$0xff]  ;;  %v714_v32 = vmul.f32 0.16666667, %v585_v19 }
  0x86   : > { %v590_v33 = vmin.f32 %v462_v20, 6.0  ;;  %v463_v34 = vmax.f32 %v335_v21, 0.0  ;;  %v464_v35 = vmax.f32 %v336_v22, 0.0  ;;  %v214_v36 = vld [vmem:[%s1272_s30 + $0x268] sm:$0xff]  ;;  %v715_v37 = vmul.f32 0.16666667, %v586_v26 }
  0x87   : > { %v716_v38 = vmul.f32 0.16666667, %v587_v27  ;;  %v717_v39 = vmul.f32 0.16666667, %v588_v28  ;;  %842 = vst [vmem:[%s1294_s17 + $0x200] sm:$0xff] %v714_v32  ;;  %v337_v44 = vadd.f32 3.0, %v209_v23 }
  0x88   : > { %v718_v40 = vmul.f32 0.16666667, %v589_v29  ;;  %v719_v41 = vmul.f32 0.16666667, %v590_v33  ;;  %v591_v42 = vmin.f32 %v463_v34, 6.0  ;;  %v592_v43 = vmin.f32 %v464_v35, 6.0 }
  0x89   : > { %843 = vst [vmem:[%s1294_s17 + $0x208] sm:$0xff] %v715_v37  ;;  %844 = vst [vmem:[%s1294_s17 + $0x210] sm:$0xff] %v716_v38  ;;  %v338_v45 = vadd.f32 3.0, %v210_v24  ;;  %v339_v46 = vadd.f32 3.0, %v211_v25  ;;  %v340_v47 = vadd.f32 3.0, %v212_v30  ;;  %v215_v48 = vld [vmem:[%s1272_s30 + $0x270] sm:$0xff] }
  0x8a   : > { %845 = vst [vmem:[%s1294_s17 + $0x218] sm:$0xff] %v717_v39  ;;  %v216_v49 = vld [vmem:[%s1272_s30 + $0x278] sm:$0xff]  ;;  %846 = vst [vmem:[%s1294_s17 + $0x220] sm:$0xff] %v718_v40  ;;  %v720_v50 = vmul.f32 0.16666667, %v591_v42  ;;  %v341_v52 = vadd.f32 3.0, %v213_v31 }
  0x8b   : > { %847 = vst [vmem:[%s1294_s17 + $0x228] sm:$0xff] %v719_v41  ;;  %v721_v51 = vmul.f32 0.16666667, %v592_v43  ;;  %v342_v53 = vadd.f32 3.0, %v214_v36  ;;  %v465_v54 = vmax.f32 %v337_v44, 0.0  ;;  %v466_v55 = vmax.f32 %v338_v45, 0.0 }
  0x8c   : > { %v467_v56 = vmax.f32 %v339_v46, 0.0  ;;  %v468_v57 = vmax.f32 %v340_v47, 0.0  ;;  %848 = vst [vmem:[%s1294_s17 + $0x230] sm:$0xff] %v720_v50  ;;  %v469_v58 = vmax.f32 %v341_v52, 0.0  ;;  %v343_v60 = vadd.f32 3.0, %v215_v48  ;;  %v217_v62 = vld [vmem:[%s1272_s30 + $0x280] sm:$0xff] }
  0x8d   : > { %849 = vst [vmem:[%s1294_s17 + $0x238] sm:$0xff] %v721_v51  ;;  %v470_v59 = vmax.f32 %v342_v53, 0.0  ;;  %v344_v61 = vadd.f32 3.0, %v216_v49  ;;  %v218_v63 = vld [vmem:[%s1272_s30 + $0x288] sm:$0xff]  ;;  %v593_v0 = vmin.f32 %v465_v54, 6.0  ;;  %v594_v1 = vmin.f32 %v466_v55, 6.0 }
  0x8e   : > { %v595_v2 = vmin.f32 %v467_v56, 6.0  ;;  %v596_v3 = vmin.f32 %v468_v57, 6.0  ;;  %v219_v4 = vld [vmem:[%s1272_s30 + $0x290] sm:$0xff]  ;;  %v220_v5 = vld [vmem:[%s1272_s30 + $0x298] sm:$0xff]  ;;  %v597_v6 = vmin.f32 %v469_v58, 6.0  ;;  %v471_v8 = vmax.f32 %v343_v60, 0.0 }
  0x8f   : > { %v598_v7 = vmin.f32 %v470_v59, 6.0  ;;  %v472_v9 = vmax.f32 %v344_v61, 0.0  ;;  %v221_v10 = vld [vmem:[%s1272_s30 + $0x2a0] sm:$0xff]  ;;  %v222_v11 = vld [vmem:[%s1272_s30 + $0x2a8] sm:$0xff]  ;;  %v722_v12 = vmul.f32 0.16666667, %v593_v0 }
  0x90   : > { %v723_v13 = vmul.f32 0.16666667, %v594_v1  ;;  %v724_v14 = vmul.f32 0.16666667, %v595_v2  ;;  %v725_v15 = vmul.f32 0.16666667, %v596_v3 }
  0x91   : > { %v726_v16 = vmul.f32 0.16666667, %v597_v6  ;;  %v727_v17 = vmul.f32 0.16666667, %v598_v7  ;;  %850 = vst [vmem:[%s1294_s17 + $0x240] sm:$0xff] %v722_v12  ;;  %v599_v18 = vmin.f32 %v471_v8, 6.0 }
  0x92   : > { %851 = vst [vmem:[%s1294_s17 + $0x248] sm:$0xff] %v723_v13  ;;  %852 = vst [vmem:[%s1294_s17 + $0x250] sm:$0xff] %v724_v14  ;;  %v600_v19 = vmin.f32 %v472_v9, 6.0  ;;  %v345_v20 = vadd.f32 3.0, %v217_v62  ;;  %v346_v21 = vadd.f32 3.0, %v218_v63  ;;  %v347_v22 = vadd.f32 3.0, %v219_v4 }
  0x93   : > { %853 = vst [vmem:[%s1294_s17 + $0x258] sm:$0xff] %v725_v15  ;;  %854 = vst [vmem:[%s1294_s17 + $0x260] sm:$0xff] %v726_v16  ;;  %v348_v23 = vadd.f32 3.0, %v220_v5  ;;  %v349_v24 = vadd.f32 3.0, %v221_v10  ;;  %v350_v25 = vadd.f32 3.0, %v222_v11  ;;  %v223_v26 = vld [vmem:[%s1272_s30 + $0x2b0] sm:$0xff] }
  0x94   : > { %855 = vst [vmem:[%s1294_s17 + $0x268] sm:$0xff] %v727_v17  ;;  %v224_v27 = vld [vmem:[%s1272_s30 + $0x2b8] sm:$0xff]  ;;  %v728_v28 = vmul.f32 0.16666667, %v599_v18  ;;  %v729_v29 = vmul.f32 0.16666667, %v600_v19 }
  0x95   : > { %v473_v30 = vmax.f32 %v345_v20, 0.0  ;;  %v474_v31 = vmax.f32 %v346_v21, 0.0  ;;  %v475_v32 = vmax.f32 %v347_v22, 0.0  ;;  %v476_v33 = vmax.f32 %v348_v23, 0.0  ;;  %v225_v36 = vld [vmem:[%s1272_s30 + $0x2c0] sm:$0xff]  ;;  %v226_v41 = vld [vmem:[%s1272_s30 + $0x2c8] sm:$0xff] }
  0x96   : > { %v477_v34 = vmax.f32 %v349_v24, 0.0  ;;  %v478_v35 = vmax.f32 %v350_v25, 0.0  ;;  %856 = vst [vmem:[%s1294_s17 + $0x270] sm:$0xff] %v728_v28  ;;  %857 = vst [vmem:[%s1294_s17 + $0x278] sm:$0xff] %v729_v29  ;;  %v351_v39 = vadd.f32 3.0, %v223_v26  ;;  %v352_v40 = vadd.f32 3.0, %v224_v27 }
  0x97   : > { %v601_v37 = vmin.f32 %v473_v30, 6.0  ;;  %v602_v38 = vmin.f32 %v474_v31, 6.0  ;;  %v227_v42 = vld [vmem:[%s1272_s30 + $0x2d0] sm:$0xff]  ;;  %v228_v43 = vld [vmem:[%s1272_s30 + $0x2d8] sm:$0xff]  ;;  %v603_v44 = vmin.f32 %v475_v32, 6.0  ;;  %v604_v45 = vmin.f32 %v476_v33, 6.0 }
  0x98   : > { %v605_v46 = vmin.f32 %v477_v34, 6.0  ;;  %v606_v47 = vmin.f32 %v478_v35, 6.0  ;;  %v229_v48 = vld [vmem:[%s1272_s30 + $0x2e0] sm:$0xff]  ;;  %v230_v49 = vld [vmem:[%s1272_s30 + $0x2e8] sm:$0xff]  ;;  %v479_v52 = vmax.f32 %v351_v39, 0.0  ;;  %v480_v53 = vmax.f32 %v352_v40, 0.0 }
  0x99   : > { %v730_v50 = vmul.f32 0.16666667, %v601_v37  ;;  %v731_v51 = vmul.f32 0.16666667, %v602_v38  ;;  %v732_v54 = vmul.f32 0.16666667, %v603_v44 }
  0x9a   : > { %v733_v55 = vmul.f32 0.16666667, %v604_v45  ;;  %v734_v56 = vmul.f32 0.16666667, %v605_v46  ;;  %v735_v57 = vmul.f32 0.16666667, %v606_v47 }
  0x9b   : > { %858 = vst [vmem:[%s1294_s17 + $0x280] sm:$0xff] %v730_v50  ;;  %859 = vst [vmem:[%s1294_s17 + $0x288] sm:$0xff] %v731_v51  ;;  %v607_v58 = vmin.f32 %v479_v52, 6.0  ;;  %v608_v59 = vmin.f32 %v480_v53, 6.0  ;;  %v353_v60 = vadd.f32 3.0, %v225_v36  ;;  %v354_v61 = vadd.f32 3.0, %v226_v41 }
  0x9c   : > { %860 = vst [vmem:[%s1294_s17 + $0x290] sm:$0xff] %v732_v54  ;;  %861 = vst [vmem:[%s1294_s17 + $0x298] sm:$0xff] %v733_v55  ;;  %v355_v62 = vadd.f32 3.0, %v227_v42  ;;  %v356_v63 = vadd.f32 3.0, %v228_v43  ;;  %v357_v0 = vadd.f32 3.0, %v229_v48  ;;  %v231_v1 = vld [vmem:[%s1272_s30 + $0x2f0] sm:$0xff] }
  0x9d   : > { %862 = vst [vmem:[%s1294_s17 + $0x2a0] sm:$0xff] %v734_v56  ;;  %v232_v2 = vld [vmem:[%s1272_s30 + $0x2f8] sm:$0xff]  ;;  %863 = vst [vmem:[%s1294_s17 + $0x2a8] sm:$0xff] %v735_v57  ;;  %v736_v3 = vmul.f32 0.16666667, %v607_v58  ;;  %v481_v5 = vmax.f32 %v353_v60, 0.0 }
  0x9e   : > { %v737_v4 = vmul.f32 0.16666667, %v608_v59  ;;  %v358_v6 = vadd.f32 3.0, %v230_v49  ;;  %v482_v7 = vmax.f32 %v354_v61, 0.0  ;;  %v483_v8 = vmax.f32 %v355_v62, 0.0  ;;  %v233_v15 = vld [vmem:[%s1272_s30 + $0x300] sm:$0xff] }
  0x9f   : > { %v484_v9 = vmax.f32 %v356_v63, 0.0  ;;  %v485_v10 = vmax.f32 %v357_v0, 0.0  ;;  %864 = vst [vmem:[%s1294_s17 + $0x2b0] sm:$0xff] %v736_v3  ;;  %v609_v11 = vmin.f32 %v481_v5, 6.0  ;;  %v359_v13 = vadd.f32 3.0, %v231_v1  ;;  %v234_v16 = vld [vmem:[%s1272_s30 + $0x308] sm:$0xff] }
  0xa0   : > { %865 = vst [vmem:[%s1294_s17 + $0x2b8] sm:$0xff] %v737_v4  ;;  %v486_v12 = vmax.f32 %v358_v6, 0.0  ;;  %v360_v14 = vadd.f32 3.0, %v232_v2  ;;  %v235_v17 = vld [vmem:[%s1272_s30 + $0x310] sm:$0xff]  ;;  %v610_v18 = vmin.f32 %v482_v7, 6.0  ;;  %v611_v19 = vmin.f32 %v483_v8, 6.0 }
  0xa1   : > { %v612_v20 = vmin.f32 %v484_v9, 6.0  ;;  %v613_v21 = vmin.f32 %v485_v10, 6.0  ;;  %v236_v22 = vld [vmem:[%s1272_s30 + $0x318] sm:$0xff]  ;;  %v237_v23 = vld [vmem:[%s1272_s30 + $0x320] sm:$0xff]  ;;  %v738_v24 = vmul.f32 0.16666667, %v609_v11 }
  0xa2   : > { %v614_v25 = vmin.f32 %v486_v12, 6.0  ;;  %v487_v26 = vmax.f32 %v359_v13, 0.0  ;;  %v488_v27 = vmax.f32 %v360_v14, 0.0  ;;  %v238_v28 = vld [vmem:[%s1272_s30 + $0x328] sm:$0xff]  ;;  %v739_v29 = vmul.f32 0.16666667, %v610_v18 }
  0xa3   : > { %v740_v30 = vmul.f32 0.16666667, %v611_v19  ;;  %v741_v31 = vmul.f32 0.16666667, %v612_v20  ;;  %866 = vst [vmem:[%s1294_s17 + $0x2c0] sm:$0xff] %v738_v24  ;;  %v361_v36 = vadd.f32 3.0, %v233_v15 }
  0xa4   : > { %v742_v32 = vmul.f32 0.16666667, %v613_v21  ;;  %v743_v33 = vmul.f32 0.16666667, %v614_v25  ;;  %v615_v34 = vmin.f32 %v487_v26, 6.0  ;;  %v616_v35 = vmin.f32 %v488_v27, 6.0 }
  0xa5   : > { %867 = vst [vmem:[%s1294_s17 + $0x2c8] sm:$0xff] %v739_v29  ;;  %868 = vst [vmem:[%s1294_s17 + $0x2d0] sm:$0xff] %v740_v30  ;;  %v362_v37 = vadd.f32 3.0, %v234_v16  ;;  %v363_v38 = vadd.f32 3.0, %v235_v17  ;;  %v364_v39 = vadd.f32 3.0, %v236_v22  ;;  %v239_v40 = vld [vmem:[%s1272_s30 + $0x330] sm:$0xff] }
  0xa6   : > { %869 = vst [vmem:[%s1294_s17 + $0x2d8] sm:$0xff] %v741_v31  ;;  %v240_v41 = vld [vmem:[%s1272_s30 + $0x338] sm:$0xff]  ;;  %870 = vst [vmem:[%s1294_s17 + $0x2e0] sm:$0xff] %v742_v32  ;;  %v744_v42 = vmul.f32 0.16666667, %v615_v34  ;;  %v365_v44 = vadd.f32 3.0, %v237_v23 }
  0xa7   : > { %871 = vst [vmem:[%s1294_s17 + $0x2e8] sm:$0xff] %v743_v33  ;;  %v745_v43 = vmul.f32 0.16666667, %v616_v35  ;;  %v366_v45 = vadd.f32 3.0, %v238_v28  ;;  %v489_v46 = vmax.f32 %v361_v36, 0.0  ;;  %v490_v47 = vmax.f32 %v362_v37, 0.0 }
  0xa8   : > { %v491_v48 = vmax.f32 %v363_v38, 0.0  ;;  %v492_v49 = vmax.f32 %v364_v39, 0.0  ;;  %872 = vst [vmem:[%s1294_s17 + $0x2f0] sm:$0xff] %v744_v42  ;;  %v493_v50 = vmax.f32 %v365_v44, 0.0  ;;  %v367_v52 = vadd.f32 3.0, %v239_v40  ;;  %v241_v54 = vld [vmem:[%s1272_s30 + $0x340] sm:$0xff] }
  0xa9   : > { %873 = vst [vmem:[%s1294_s17 + $0x2f8] sm:$0xff] %v745_v43  ;;  %v494_v51 = vmax.f32 %v366_v45, 0.0  ;;  %v368_v53 = vadd.f32 3.0, %v240_v41  ;;  %v242_v55 = vld [vmem:[%s1272_s30 + $0x348] sm:$0xff]  ;;  %v617_v56 = vmin.f32 %v489_v46, 6.0  ;;  %v618_v57 = vmin.f32 %v490_v47, 6.0 }
  0xaa   : > { %v619_v58 = vmin.f32 %v491_v48, 6.0  ;;  %v620_v59 = vmin.f32 %v492_v49, 6.0  ;;  %v243_v60 = vld [vmem:[%s1272_s30 + $0x350] sm:$0xff]  ;;  %v244_v61 = vld [vmem:[%s1272_s30 + $0x358] sm:$0xff]  ;;  %v621_v62 = vmin.f32 %v493_v50, 6.0  ;;  %v495_v0 = vmax.f32 %v367_v52, 0.0 }
  0xab   : > { %v622_v63 = vmin.f32 %v494_v51, 6.0  ;;  %v496_v1 = vmax.f32 %v368_v53, 0.0  ;;  %v245_v2 = vld [vmem:[%s1272_s30 + $0x360] sm:$0xff]  ;;  %v246_v3 = vld [vmem:[%s1272_s30 + $0x368] sm:$0xff]  ;;  %v746_v4 = vmul.f32 0.16666667, %v617_v56 }
  0xac   : > { %v747_v5 = vmul.f32 0.16666667, %v618_v57  ;;  %v748_v6 = vmul.f32 0.16666667, %v619_v58  ;;  %v749_v7 = vmul.f32 0.16666667, %v620_v59 }
  0xad   : > { %v750_v8 = vmul.f32 0.16666667, %v621_v62  ;;  %v751_v9 = vmul.f32 0.16666667, %v622_v63  ;;  %874 = vst [vmem:[%s1294_s17 + $0x300] sm:$0xff] %v746_v4  ;;  %v623_v10 = vmin.f32 %v495_v0, 6.0 }
  0xae   : > { %875 = vst [vmem:[%s1294_s17 + $0x308] sm:$0xff] %v747_v5  ;;  %876 = vst [vmem:[%s1294_s17 + $0x310] sm:$0xff] %v748_v6  ;;  %v624_v11 = vmin.f32 %v496_v1, 6.0  ;;  %v369_v12 = vadd.f32 3.0, %v241_v54  ;;  %v370_v13 = vadd.f32 3.0, %v242_v55  ;;  %v371_v14 = vadd.f32 3.0, %v243_v60 }
  0xaf   : > { %877 = vst [vmem:[%s1294_s17 + $0x318] sm:$0xff] %v749_v7  ;;  %878 = vst [vmem:[%s1294_s17 + $0x320] sm:$0xff] %v750_v8  ;;  %v372_v15 = vadd.f32 3.0, %v244_v61  ;;  %v373_v16 = vadd.f32 3.0, %v245_v2  ;;  %v374_v17 = vadd.f32 3.0, %v246_v3  ;;  %v247_v18 = vld [vmem:[%s1272_s30 + $0x370] sm:$0xff] }
  0xb0   : > { %879 = vst [vmem:[%s1294_s17 + $0x328] sm:$0xff] %v751_v9  ;;  %v248_v19 = vld [vmem:[%s1272_s30 + $0x378] sm:$0xff]  ;;  %v752_v20 = vmul.f32 0.16666667, %v623_v10  ;;  %v753_v21 = vmul.f32 0.16666667, %v624_v11 }
  0xb1   : > { %v497_v22 = vmax.f32 %v369_v12, 0.0  ;;  %v498_v23 = vmax.f32 %v370_v13, 0.0  ;;  %v499_v24 = vmax.f32 %v371_v14, 0.0  ;;  %v500_v25 = vmax.f32 %v372_v15, 0.0  ;;  %v249_v28 = vld [vmem:[%s1272_s30 + $0x380] sm:$0xff]  ;;  %v250_v33 = vld [vmem:[%s1272_s30 + $0x388] sm:$0xff] }
  0xb2   : > { %v501_v26 = vmax.f32 %v373_v16, 0.0  ;;  %v502_v27 = vmax.f32 %v374_v17, 0.0  ;;  %880 = vst [vmem:[%s1294_s17 + $0x330] sm:$0xff] %v752_v20  ;;  %881 = vst [vmem:[%s1294_s17 + $0x338] sm:$0xff] %v753_v21  ;;  %v375_v31 = vadd.f32 3.0, %v247_v18  ;;  %v376_v32 = vadd.f32 3.0, %v248_v19 }
  0xb3   : > { %v625_v29 = vmin.f32 %v497_v22, 6.0  ;;  %v626_v30 = vmin.f32 %v498_v23, 6.0  ;;  %v251_v34 = vld [vmem:[%s1272_s30 + $0x390] sm:$0xff]  ;;  %v252_v35 = vld [vmem:[%s1272_s30 + $0x398] sm:$0xff]  ;;  %v627_v36 = vmin.f32 %v499_v24, 6.0  ;;  %v628_v37 = vmin.f32 %v500_v25, 6.0 }
  0xb4   : > { %v629_v38 = vmin.f32 %v501_v26, 6.0  ;;  %v630_v39 = vmin.f32 %v502_v27, 6.0  ;;  %v253_v40 = vld [vmem:[%s1272_s30 + $0x3a0] sm:$0xff]  ;;  %v254_v41 = vld [vmem:[%s1272_s30 + $0x3a8] sm:$0xff]  ;;  %v503_v44 = vmax.f32 %v375_v31, 0.0  ;;  %v504_v45 = vmax.f32 %v376_v32, 0.0 }
  0xb5   : > { %v754_v42 = vmul.f32 0.16666667, %v625_v29  ;;  %v755_v43 = vmul.f32 0.16666667, %v626_v30  ;;  %v756_v46 = vmul.f32 0.16666667, %v627_v36 }
  0xb6   : > { %v757_v47 = vmul.f32 0.16666667, %v628_v37  ;;  %v758_v48 = vmul.f32 0.16666667, %v629_v38  ;;  %v759_v49 = vmul.f32 0.16666667, %v630_v39 }
  0xb7   : > { %882 = vst [vmem:[%s1294_s17 + $0x340] sm:$0xff] %v754_v42  ;;  %883 = vst [vmem:[%s1294_s17 + $0x348] sm:$0xff] %v755_v43  ;;  %v631_v50 = vmin.f32 %v503_v44, 6.0  ;;  %v632_v51 = vmin.f32 %v504_v45, 6.0  ;;  %v377_v52 = vadd.f32 3.0, %v249_v28  ;;  %v378_v53 = vadd.f32 3.0, %v250_v33 }
  0xb8   : > { %884 = vst [vmem:[%s1294_s17 + $0x350] sm:$0xff] %v756_v46  ;;  %885 = vst [vmem:[%s1294_s17 + $0x358] sm:$0xff] %v757_v47  ;;  %v379_v54 = vadd.f32 3.0, %v251_v34  ;;  %v380_v55 = vadd.f32 3.0, %v252_v35  ;;  %v381_v56 = vadd.f32 3.0, %v253_v40  ;;  %v255_v57 = vld [vmem:[%s1272_s30 + $0x3b0] sm:$0xff] }
  0xb9   : > { %886 = vst [vmem:[%s1294_s17 + $0x360] sm:$0xff] %v758_v48  ;;  %v256_v58 = vld [vmem:[%s1272_s30 + $0x3b8] sm:$0xff]  ;;  %887 = vst [vmem:[%s1294_s17 + $0x368] sm:$0xff] %v759_v49  ;;  %v760_v59 = vmul.f32 0.16666667, %v631_v50  ;;  %v505_v61 = vmax.f32 %v377_v52, 0.0 }
  0xba   : > { %v761_v60 = vmul.f32 0.16666667, %v632_v51  ;;  %v382_v62 = vadd.f32 3.0, %v254_v41  ;;  %v506_v63 = vmax.f32 %v378_v53, 0.0  ;;  %v507_v0 = vmax.f32 %v379_v54, 0.0  ;;  %v257_v7 = vld [vmem:[%s1272_s30 + $0x3c0] sm:$0xff] }
  0xbb   : > { %v508_v1 = vmax.f32 %v380_v55, 0.0  ;;  %v509_v2 = vmax.f32 %v381_v56, 0.0  ;;  %888 = vst [vmem:[%s1294_s17 + $0x370] sm:$0xff] %v760_v59  ;;  %v633_v3 = vmin.f32 %v505_v61, 6.0  ;;  %v383_v5 = vadd.f32 3.0, %v255_v57  ;;  %v258_v8 = vld [vmem:[%s1272_s30 + $0x3c8] sm:$0xff] }
  0xbc   : > { %889 = vst [vmem:[%s1294_s17 + $0x378] sm:$0xff] %v761_v60  ;;  %v510_v4 = vmax.f32 %v382_v62, 0.0  ;;  %v384_v6 = vadd.f32 3.0, %v256_v58  ;;  %v259_v9 = vld [vmem:[%s1272_s30 + $0x3d0] sm:$0xff]  ;;  %v634_v10 = vmin.f32 %v506_v63, 6.0  ;;  %v635_v11 = vmin.f32 %v507_v0, 6.0 }
  0xbd   : > { %v636_v12 = vmin.f32 %v508_v1, 6.0  ;;  %v637_v13 = vmin.f32 %v509_v2, 6.0  ;;  %v260_v14 = vld [vmem:[%s1272_s30 + $0x3d8] sm:$0xff]  ;;  %v261_v15 = vld [vmem:[%s1272_s30 + $0x3e0] sm:$0xff]  ;;  %v762_v16 = vmul.f32 0.16666667, %v633_v3 }
  0xbe   : > { %v638_v17 = vmin.f32 %v510_v4, 6.0  ;;  %v511_v18 = vmax.f32 %v383_v5, 0.0  ;;  %v512_v19 = vmax.f32 %v384_v6, 0.0  ;;  %v262_v20 = vld [vmem:[%s1272_s30 + $0x3e8] sm:$0xff]  ;;  %v763_v21 = vmul.f32 0.16666667, %v634_v10 }
  0xbf   : > { %v764_v22 = vmul.f32 0.16666667, %v635_v11  ;;  %v765_v23 = vmul.f32 0.16666667, %v636_v12  ;;  %890 = vst [vmem:[%s1294_s17 + $0x380] sm:$0xff] %v762_v16  ;;  %v385_v28 = vadd.f32 3.0, %v257_v7 }
  0xc0   : > { %v766_v24 = vmul.f32 0.16666667, %v637_v13  ;;  %v767_v25 = vmul.f32 0.16666667, %v638_v17  ;;  %v639_v26 = vmin.f32 %v511_v18, 6.0  ;;  %v640_v27 = vmin.f32 %v512_v19, 6.0 }
  0xc1   : > { %891 = vst [vmem:[%s1294_s17 + $0x388] sm:$0xff] %v763_v21  ;;  %892 = vst [vmem:[%s1294_s17 + $0x390] sm:$0xff] %v764_v22  ;;  %v386_v29 = vadd.f32 3.0, %v258_v8  ;;  %v387_v30 = vadd.f32 3.0, %v259_v9  ;;  %v388_v31 = vadd.f32 3.0, %v260_v14  ;;  %v263_v32 = vld [vmem:[%s1272_s30 + $0x3f0] sm:$0xff] }
  0xc2   : > { %893 = vst [vmem:[%s1294_s17 + $0x398] sm:$0xff] %v765_v23  ;;  %v264_v33 = vld [vmem:[%s1272_s30 + $0x3f8] sm:$0xff]  ;;  %894 = vst [vmem:[%s1294_s17 + $0x3a0] sm:$0xff] %v766_v24  ;;  %v768_v34 = vmul.f32 0.16666667, %v639_v26  ;;  %v389_v36 = vadd.f32 3.0, %v261_v15 }
  0xc3   : > { %895 = vst [vmem:[%s1294_s17 + $0x3a8] sm:$0xff] %v767_v25  ;;  %v769_v35 = vmul.f32 0.16666667, %v640_v27  ;;  %v390_v37 = vadd.f32 3.0, %v262_v20  ;;  %v513_v38 = vmax.f32 %v385_v28, 0.0  ;;  %v514_v39 = vmax.f32 %v386_v29, 0.0 }
  0xc4   : > { %v515_v40 = vmax.f32 %v387_v30, 0.0  ;;  %v516_v41 = vmax.f32 %v388_v31, 0.0  ;;  %896 = vst [vmem:[%s1294_s17 + $0x3b0] sm:$0xff] %v768_v34  ;;  %v517_v42 = vmax.f32 %v389_v36, 0.0  ;;  %v391_v44 = vadd.f32 3.0, %v263_v32  ;;  %s907_s2 = scalar_lea.sflag [#allocation4], %s1266_s23 }
  0xc5   : > { %897 = vst [vmem:[%s1294_s17 + $0x3b8] sm:$0xff] %v769_v35  ;;  %v518_v43 = vmax.f32 %v390_v37, 0.0  ;;  %v392_v45 = vadd.f32 3.0, %v264_v33  ;;  %v641_v46 = vmin.f32 %v513_v38, 6.0  ;;  %v642_v47 = vmin.f32 %v514_v39, 6.0  ;;  %s1087_s3 = scalar_lea.vmem %s1543_s27, 16384 }
  0xc6   : > { %v643_v48 = vmin.f32 %v515_v40, 6.0  ;;  %v644_v49 = vmin.f32 %v516_v41, 6.0  ;;  %v645_v50 = vmin.f32 %v517_v42, 6.0  ;;  %v519_v52 = vmax.f32 %v391_v44, 0.0  ;;  %p1088_p11 = scmp.ne.s32.totalorder %s1543_s27, %s1087_s3  ;;  %p1598_p12 = scmp.ne.s32.totalorder %s1594_s18, 0 }
  0xc7   : > { %v646_v51 = vmin.f32 %v518_v43, 6.0  ;;  %v520_v53 = vmax.f32 %v392_v45, 0.0  ;;  %v770_v54 = vmul.f32 0.16666667, %v641_v46  ;;  %v771_v55 = vmul.f32 0.16666667, %v642_v47 }
  0xc8   : > { %v772_v56 = vmul.f32 0.16666667, %v643_v48  ;;  %v773_v57 = vmul.f32 0.16666667, %v644_v49  ;;  %v774_v58 = vmul.f32 0.16666667, %v645_v50  ;;  %p1089_p13 = pnand %p1088_p11, %p1598_p12 }
  0xc9   : > { %v775_v59 = vmul.f32 0.16666667, %v646_v51  ;;  %898 = vst [vmem:[%s1294_s17 + $0x3c0] sm:$0xff] %v770_v54  ;;  %899 = vst [vmem:[%s1294_s17 + $0x3c8] sm:$0xff] %v771_v55  ;;  %v647_v60 = vmin.f32 %v519_v52, 6.0  ;;  %v648_v61 = vmin.f32 %v520_v53, 6.0 }
  0xca   : > { %900 = vst [vmem:[%s1294_s17 + $0x3d0] sm:$0xff] %v772_v56  ;;  %901 = vst [vmem:[%s1294_s17 + $0x3d8] sm:$0xff] %v773_v57  ;;  %p1090_p4 = pneg %p1089_p13  ;;  %s1156_s4 = smov [#allocation5]  }
  0xcb   : > { %902 = vst [vmem:[%s1294_s17 + $0x3e0] sm:$0xff] %v774_v58  ;;  %903 = vst [vmem:[%s1294_s17 + $0x3e8] sm:$0xff] %v775_v59  ;;  %v776_v62 = vmul.f32 0.16666667, %v647_v60  ;;  %v777_v63 = vmul.f32 0.16666667, %v648_v61 }
  0xcc   : > { %s1091_s5 = sshll.u32 %s1156_s4, 4  ;;  %s1092_s5 = int_to_ptr.vmem [resolvable:$false] %s1091_s5 }
  0xcd   : > { %904 = vst [vmem:[%s1294_s17 + $0x3f0] sm:$0xff] %v776_v62  ;;  %905 = vst [vmem:[%s1294_s17 + $0x3f8] sm:$0xff] %v777_v63  ;;  %s1093_s11 = scalar_lea.vmem %s1092_s5, 32768  ;;  %p1094_p5 = scmp.lt.s32.totalorder %s1543_s27, %s1092_s5 }
  0xce   : > { %p1095_p7 = scmp.lt.s32.totalorder %s1093_s11, %s1087_s3 }
  0xd0   : > { %p1096_p8 = por %p1095_p7, %p1094_p5 }
  0xd2   : > { %p1097_p10 = pnand %p1096_p8, %p1090_p4 }
  0xd4   : > { %1100 = shalt.err (!%p1097_p10)
}
  0xd5   : > { %s1101_s13 = scalar_lea.hbm %s1541_s29, 16384  ;;  %s1105_s20 = scalar_lea.hbm %s1589_s1, 32768 }
  0xd6   : > { %p1102_p0 = scmp.ne.s32.totalorder %s1541_s29, %s1101_s13  ;;  %p1106_p1 = scmp.lt.s32.totalorder %s1541_s29, %s1589_s1 }
  0xd7   : > { %p1107_p3 = scmp.lt.s32.totalorder %s1105_s20, %s1101_s13 }
  0xd8   : > { %p1103_p2 = pnand %p1102_p0, %p1598_p12 }
  0xd9   : > { %p1108_p6 = por %p1107_p3, %p1106_p1 }
  0xda   : > { %p1104_p9 = pneg %p1103_p2 }
  0xdc   : > { %p1109_p11 = pnand %p1108_p6, %p1104_p9 }
  0xde   : > { %1112 = shalt.err (!%p1109_p11)
}
  0xdf   : > { %s1157_s24 = smov 128   ;;  %s1158_s26 = smov 8  }
  0xe0   : > { %1011 = dma.vmem_to_hbm [thread:$0]  (%p1598_p12), %s1543_s27, 16384, %s1541_s29, %s907_s2, %s1157_s24, %s1157_s24, %s1158_s26  }
  0xe1 PF: > { %s935_s30 = sand.u32 1, %s1139_s6   ;;  %p1599_p13 = scmp.ne.s32.totalorder %s1595_s19, 0 }
  0xe2   : > { %p1600_p4 = scmp.ge.s32.totalorder %s1151_s9, 2  ;;  %s936_s17 = scalar_lea.sflag [#allocation4], %s935_s30 }
  0xe4   : > { %p1018_p5 = pnand %p1600_p4, %p1599_p13 }
  0xe6   : > { %p1019_p7 = pneg %p1018_p5 }
  0xe8   : > { %1134 = dma.done.wait (%p1019_p7), %s936_s17, 16384  }
  0xe9   : > { %1136 = vsyncadd (%p1019_p7), %s936_s17, 4294950912  ;;  %p14_p8 = scmp.ge.s32.totalorder %s1194_s12, 4   ;;  %s1601_s6 = smov %s1143_s7 }
  0xea   : > { %s1602_s7 = smov %s1147_s8  ;;  %s1603_s8 = smov %s1206_s15 }
  0xeb   : > { %s1604_s9 = smov %s1194_s12  ;;  %16 = sbr.rel (!%p14_p8) target bundleno = 5 (0x5), region = 69 }
  0xf0   :  { %941 = vsyncpa [#allocation3], 1 }
  0xf1   :  { %943 = vsyncpa [#allocation3 + $0x1], 1 }
  0xf2   :  { %944 = vsyncpa [#allocation4], 1 }
  0xf3   :  { %946 = vsyncpa [#allocation4 + $0x1], 1 }

</bundles_post_ra>
